<compile_context>
chip_gen: v7x
topology: tpu7x:2x2x1
jax: 0.10.0
libtpu: 0.0.40
codegen_flags: <defaults>
</compile_context>

<pallas_src>
import math

import jax
import jax.numpy as jnp
from jax.experimental import pallas as pl
from jax.experimental.pallas import tpu as pltpu

NFB = 512
NDIM = 256
IN_DIM = 2 * NFB      # 1024
OUT_DIM = 2
OUT_PAD = 128         # lane-dense padded output width
DROPOUT_P = 0.1


def _mlp_train_kernel(x_ref, w_ref, b_ref, scale_ref, o_ref):
    """Folded matmul + bias + inverted-dropout scale, all in VMEM."""
    y = jnp.dot(x_ref[...], w_ref[...], preferred_element_type=jnp.float32)
    y = y + b_ref[...]
    o_ref[...] = (y * scale_ref[...]).astype(o_ref.dtype)


def _mlp_eval_kernel(x_ref, w_ref, b_ref, o_ref):
    """Folded matmul + bias."""
    y = jnp.dot(x_ref[...], w_ref[...], preferred_element_type=jnp.float32)
    y = y + b_ref[...]
    o_ref[...] = y.astype(o_ref.dtype)


def init_params(key):
    """Deterministic init mimicking torch.nn.Linear default (uniform +/- 1/sqrt(fan_in))."""
    k1, k2, k3, k4 = jax.random.split(key, 4)
    bound1 = 1.0 / math.sqrt(IN_DIM)
    bound2 = 1.0 / math.sqrt(NDIM)
    w1 = jax.random.uniform(k1, (IN_DIM, NDIM), jnp.float32, -bound1, bound1)
    b1 = jax.random.uniform(k2, (NDIM,), jnp.float32, -bound1, bound1)
    w2 = jax.random.uniform(k3, (NDIM, OUT_DIM), jnp.float32, -bound2, bound2)
    b2 = jax.random.uniform(k4, (OUT_DIM,), jnp.float32, -bound2, bound2)
    return w1, b1, w2, b2


def _round_up(n, m):
    return ((n + m - 1) // m) * m


def baseline_interaction_vision(x, params, *, dropout_key=None, mode='train', tm=512):
    """Pallas wrapper. x: [N, 1024] float32 -> [N, 2] float32."""
    w1, b1, w2, b2 = params
    N = x.shape[0]
    assert x.shape[1] == IN_DIM

    # ---- Fold the two Linears (exact: dropout is applied after the 2nd Linear) ----
    w_eff = jnp.dot(w1, w2)                       # (1024, 2)
    b_eff = jnp.dot(b1, w2) + b2                  # (2,)
    # Lane-dense padding to 128 output lanes (avoids masked vst.msk partial stores).
    w_pad = jnp.zeros((IN_DIM, OUT_PAD), jnp.float32).at[:, :OUT_DIM].set(w_eff)
    b_pad = jnp.zeros((1, OUT_PAD), jnp.float32).at[:, :OUT_DIM].set(b_eff)

    # ---- Batch tiling (TM multiple of 8, small enough for VMEM on all generations) ----
    TM = min(tm, _round_up(N, 8))
    N_pad = _round_up(N, TM)
    if N_pad != N:
        x = jnp.pad(x, ((0, N_pad - N), (0, 0)))
    grid = (N_pad // TM,)

    x_spec = pl.BlockSpec((TM, IN_DIM), lambda i: (i, 0))
    w_spec = pl.BlockSpec((IN_DIM, OUT_PAD), lambda i: (0, 0))   # weights stay resident
    b_spec = pl.BlockSpec((1, OUT_PAD), lambda i: (0, 0))
    o_spec = pl.BlockSpec((TM, OUT_PAD), lambda i: (i, 0))

    compiler_params = pltpu.CompilerParams(
        dimension_semantics=("parallel",),        # batch axis -> both TCs on v7x
    )
    out_shape = jax.ShapeDtypeStruct((N_pad, OUT_PAD), jnp.float32)

    if mode == 'train':
        if dropout_key is None:
            dropout_key = jax.random.PRNGKey(0)
        keep_prob = 1.0 - DROPOUT_P
        # Inverted-dropout scale mask, generated host-side (portable across TPU
        # generations and interpret mode). Only the first OUT_DIM lanes matter.
        keep = jax.random.bernoulli(dropout_key, keep_prob, (N_pad, OUT_PAD))
        scale = keep.astype(jnp.float32) * (1.0 / keep_prob)
        s_spec = pl.BlockSpec((TM, OUT_PAD), lambda i: (i, 0))

        out = pl.pallas_call(
            _mlp_train_kernel,
            out_shape=out_shape,
            grid=grid,
            in_specs=[x_spec, w_spec, b_spec, s_spec],
            out_specs=o_spec,
            compiler_params=compiler_params,
        )(x, w_pad, b_pad, scale)
    else:
        out = pl.pallas_call(
            _mlp_eval_kernel,
            out_shape=out_shape,
            grid=grid,
            in_specs=[x_spec, w_spec, b_spec],
            out_specs=o_spec,
            compiler_params=compiler_params,
        )(x, w_pad, b_pad)

    return out[:N, :OUT_DIM]


if __name__ == "__main__":
    key = jax.random.PRNGKey(0)
    k_param, k_x, k_drop = jax.random.split(key, 3)

    params = init_params(k_param)
    N = 16  # small batch of interaction pairs
    x = jax.random.normal(k_x, (N, IN_DIM), dtype=jnp.float32)

    # Train-mode forward (dropout applied via deterministic mask key).
    y_train = baseline_interaction_vision(x, params, dropout_key=k_drop, mode='train')
    y_train = jax.block_until_ready(y_train)

    # Eval-mode forward (no dropout) -- cross-check against plain-JAX reference.
    y_eval = baseline_interaction_vision(x, params, mode='eval')
    y_eval = jax.block_until_ready(y_eval)

    w1, b1, w2, b2 = params
    ref = (x @ w1 + b1) @ w2 + b2
    assert y_eval.shape == (N, OUT_DIM)
    assert y_train.shape == (N, OUT_DIM)
    assert jnp.allclose(y_eval, ref, atol=1e-4, rtol=1e-4)
    # Train-mode entries are either 0 or ref/keep_prob.
    keep_prob = 1.0 - DROPOUT_P
    nz = y_train != 0
    assert jnp.allclose(jnp.where(nz, y_train, 0.0),
                        jnp.where(nz, ref / keep_prob, 0.0), atol=1e-3, rtol=1e-3)

    print("KERNEL_OK")
</pallas_src>

<mosaic_0001>
module attributes {stable_mosaic.version = 11 : i64} {
  func.func @_mlp_train_kernel(%arg0: i32, %arg1: memref<16x1024xf32, #tpu.memory_space<vmem>>, %arg2: memref<1024x128xf32, #tpu.memory_space<vmem>>, %arg3: memref<1x128xf32, #tpu.memory_space<vmem>>, %arg4: memref<16x128xf32, #tpu.memory_space<vmem>>, %arg5: memref<16x128xf32, #tpu.memory_space<vmem>>) attributes {dimension_semantics = [#tpu.dimension_semantics<parallel>], iteration_bounds = array<i64: 1>, scalar_prefetch = 0 : i64, scratch_operands = 0 : i64, tpu.core_type = #tpu.core_type<tc>, window_params = [{transform_indices = @transform_0, window_bounds = array<i64: 16, 1024>}, {pipeline_mode = #tpu.pipeline_mode<synchronous>, transform_indices = @transform_1, window_bounds = array<i64: 1024, 128>}, {pipeline_mode = #tpu.pipeline_mode<synchronous>, transform_indices = @transform_2, window_bounds = array<i64: 1, 128>}, {transform_indices = @transform_3, window_bounds = array<i64: 16, 128>}, {transform_indices = @transform_4, window_bounds = array<i64: 16, 128>}]} {
    %c0 = arith.constant 0 : index
    %c0_0 = arith.constant 0 : index
    %0 = vector.load %arg1[%c0, %c0_0] : memref<16x1024xf32, #tpu.memory_space<vmem>>, vector<16x1024xf32>
    %c0_1 = arith.constant 0 : index
    %c0_2 = arith.constant 0 : index
    %1 = vector.load %arg2[%c0_1, %c0_2] : memref<1024x128xf32, #tpu.memory_space<vmem>>, vector<1024x128xf32>
    %cst = arith.constant dense<0.000000e+00> : vector<16x128xf32>
    %2 = tpu.matmul %0, %1, %cst {dimension_numbers = #tpu.dot_dimension_numbers<[1], [0], [0], [1], [0, 0, 1, 1], [], []>} : vector<16x1024xf32>, vector<1024x128xf32>, vector<16x128xf32> -> vector<16x128xf32>
    %c0_3 = arith.constant 0 : index
    %c0_4 = arith.constant 0 : index
    %3 = vector.load %arg3[%c0_3, %c0_4] : memref<1x128xf32, #tpu.memory_space<vmem>>, vector<1x128xf32>
    %4 = vector.broadcast %3 : vector<1x128xf32> to vector<16x128xf32>
    %5 = arith.addf %2, %4 : vector<16x128xf32>
    %c0_5 = arith.constant 0 : index
    %c0_6 = arith.constant 0 : index
    %6 = vector.load %arg4[%c0_5, %c0_6] : memref<16x128xf32, #tpu.memory_space<vmem>>, vector<16x128xf32>
    %7 = arith.mulf %5, %6 : vector<16x128xf32>
    %c0_7 = arith.constant 0 : index
    %c0_8 = arith.constant 0 : index
    %8 = vector.load %arg5[%c0_7, %c0_8] : memref<16x128xf32, #tpu.memory_space<vmem>>, vector<16x128xf32>
    tpu.vector_store %arg5[%c0_7, %c0_8], %7 {strides = array<i32>} : memref<16x128xf32, #tpu.memory_space<vmem>>, vector<16x128xf32>,
    return
  }
  func.func @transform_0(%arg0: i32) -> (i32, i32) {
    %c0_i32 = arith.constant 0 : i32
    %c0_i32_0 = arith.constant 0 : i32
    return %arg0, %c0_i32 : i32, i32
  }
  func.func @transform_1(%arg0: i32) -> (i32, i32) {
    %c0_i32 = arith.constant 0 : i32
    %c0_i32_0 = arith.constant 0 : i32
    %c0_i32_1 = arith.constant 0 : i32
    return %c0_i32, %c0_i32_0 : i32, i32
  }
  func.func @transform_2(%arg0: i32) -> (i32, i32) {
    %c0_i32 = arith.constant 0 : i32
    %c0_i32_0 = arith.constant 0 : i32
    %c0_i32_1 = arith.constant 0 : i32
    return %c0_i32, %c0_i32_0 : i32, i32
  }
  func.func @transform_3(%arg0: i32) -> (i32, i32) {
    %c0_i32 = arith.constant 0 : i32
    %c0_i32_0 = arith.constant 0 : i32
    return %arg0, %c0_i32 : i32, i32
  }
  func.func @transform_4(%arg0: i32) -> (i32, i32) {
    %c0_i32 = arith.constant 0 : i32
    %c0_i32_0 = arith.constant 0 : i32
    return %arg0, %c0_i32 : i32, i32
  }
}

</mosaic_0001>

<bundles_post_ra>
// kernel: tpu_custom_call.1
= control target key start
LH: loop header
LB: loop body
LE: loop exit
PB: predicated region body
PF: predicated region fallthrough
CT: control target
= control target key end

     0   :  { %9 = vsyncpa [#allocation3], 0  ;;  %s1010_s0 = inlined_call_operand.hbm [shape: f32[16,1024], index: 0, kind: input, shape index: {}]   ;;  %s1011_s1 = inlined_call_operand.hbm [shape: f32[1024,128], index: 1, kind: input, shape index: {}]   ;;  %s1012_s2 = inlined_call_operand.vmem [shape: f32[1,128], index: 2, kind: input, shape index: {}]   ;;  %s1013_s3 = inlined_call_operand.hbm [shape: f32[16,128], index: 3, kind: input, shape index: {}]   ;;  %s1014_s4 = inlined_call_operand.hbm [shape: f32[16,128], index: 4, kind: output, shape index: {}]  }
   0x1   :  { %10 = vsyncpa [#allocation6], 0 }
   0x2   :  { %11 = vsyncpa [#allocation4], 0  ;;  %s917_s15 = smov [#allocation5]   ;;  %s823_s19 = scalar_lea.hbm %s1011_s1, 16384 }
   0x3   :  { %s29_s16 = sshll.u32 %s917_s15, 4  ;;  %p824_p0 = scmp.ne.s32.totalorder %s1011_s1, %s823_s19  ;;  %s30_s16 = int_to_ptr.vmem [resolvable:$true] %s29_s16 }
   0x4   :  { %p827_p1 = scmp.lt.u32.totalorder %s823_s19, %s1011_s1 }
   0x6   :  { %p829_p2 = pnand %p827_p1, %p824_p0 }
   0x8   :  { %832 = shalt.err (!%p829_p2)
}
   0x9   :  { %s833_s24 = scalar_lea.vmem %s30_s16, 16384  ;;  %p838_p4 = scmp.lt.s32.totalorder %s30_s16, %s30_s16 }
   0xa   :  { %p834_p3 = scmp.ne.s32.totalorder %s30_s16, %s833_s24  ;;  %p839_p5 = scmp.lt.s32.totalorder %s833_s24, %s833_s24 }
   0xc   :  { %p840_p6 = por %p839_p5, %p838_p4 }
   0xe   :  { %p841_p7 = pnand %p840_p6, %p834_p3 }
  0x10   :  { %844 = shalt.err (!%p841_p7)
}
  0x11   :  { %s918_s25 = smov 128   ;;  %s919_s26 = smov 8  }
  0x12   :  { %35 = dma.hbm_to_vmem [thread:$0]  %s1011_s1, 16384, %s30_s16, [#allocation6], %s918_s25, %s918_s25, %s919_s26  }
  0x13   :  { %s920_s29 = smov [#allocation2]   ;;  %s845_s7 = scalar_lea.hbm %s1010_s0, 2048 }
  0x14   :  { %s17_s30 = sshll.u32 %s920_s29, 4  ;;  %p846_p8 = scmp.ne.s32.totalorder %s1010_s0, %s845_s7  ;;  %s18_s30 = int_to_ptr.vmem [resolvable:$true] %s17_s30 }
  0x15   :  { %p849_p9 = scmp.lt.u32.totalorder %s845_s7, %s1010_s0 }
  0x17   :  { %p851_p10 = pnand %p849_p9, %p846_p8 }
  0x19   :  { %854 = shalt.err (!%p851_p10)
}
  0x1a   :  { %s855_s12 = scalar_lea.vmem %s18_s30, 2048  ;;  %p860_p12 = scmp.lt.s32.totalorder %s18_s30, %s18_s30 }
  0x1b   :  { %p856_p11 = scmp.ne.s32.totalorder %s18_s30, %s855_s12  ;;  %p861_p13 = scmp.lt.s32.totalorder %s855_s12, %s855_s12 }
  0x1d   :  { %p862_p0 = por %p861_p13, %p860_p12 }
  0x1f   :  { %p863_p1 = pnand %p862_p0, %p856_p11 }
  0x21   :  { %866 = shalt.err (!%p863_p1)
}
  0x22   :  { %s921_s1 = smov 1024   ;;  %s922_s13 = smov 64  }
  0x23   :  { %23 = dma.hbm_to_vmem [thread:$0]  %s1010_s0, 2048, %s18_s30, [#allocation3], %s921_s1, %s921_s1, %s922_s13  }
  0x24   :  { %s923_s16 = smov [#allocation7]   ;;  %s867_s20 = scalar_lea.hbm %s1013_s3, 256 }
  0x25   :  { %s43_s17 = sshll.u32 %s923_s16, 4  ;;  %p868_p2 = scmp.ne.s32.totalorder %s1013_s3, %s867_s20  ;;  %s44_s17 = int_to_ptr.vmem [resolvable:$true] %s43_s17 }
  0x26   :  { %p871_p3 = scmp.lt.u32.totalorder %s867_s20, %s1013_s3 }
  0x28   :  { %p873_p4 = pnand %p871_p3, %p868_p2 }
  0x2a   :  { %876 = shalt.err (!%p873_p4)
}
  0x2b   :  { %s877_s27 = scalar_lea.vmem %s44_s17, 256  ;;  %p882_p6 = scmp.lt.s32.totalorder %s44_s17, %s44_s17 }
  0x2c   :  { %p878_p5 = scmp.ne.s32.totalorder %s44_s17, %s877_s27  ;;  %p883_p7 = scmp.lt.s32.totalorder %s877_s27, %s877_s27 }
  0x2e   :  { %p884_p8 = por %p883_p7, %p882_p6 }
  0x30   :  { %p885_p9 = pnand %p884_p8, %p878_p5 }
  0x32   :  { %888 = shalt.err (!%p885_p9)
}
  0x33   :  { %49 = dma.hbm_to_vmem [thread:$0]  %s1013_s3, 256, %s44_s17, [#allocation6], %s918_s25, %s918_s25, %s919_s26  }
  0x34   :  { %911 = dma.done.wait [#allocation3], 2048  }
  0x35   :  { %912 = vsyncadd [#allocation3], 4294965248 }
  0x36   :  { %913 = dma.done.wait [#allocation6], 16640  }
  0x37   :  { %914 = vsyncadd [#allocation6], 4294950656  ;;  %v91_v0 = vld [vmem:[#allocation5 + $0x80] sm:$0xff]  ;;  %v92_v1 = vld [vmem:[#allocation5 + $0x88] sm:$0xff] }
  0x38   :  { %v75_v2 = vld [vmem:[#allocation5] sm:$0xff]  ;;  %v687_v3 = vpack.c.bf16 %v92_v1, %v91_v0  ;;  %v76_v4 = vld [vmem:[#allocation5 + $0x8] sm:$0xff]  ;;  %v93_v11 = vld [vmem:[#allocation5 + $0x90] sm:$0xff] }
  0x39   :  { %v123_v5 = vld [vmem:[#allocation5 + $0x180] sm:$0xff]  ;;  %v124_v6 = vld [vmem:[#allocation5 + $0x188] sm:$0xff]  ;;  %v689_v7 = vpack.c.bf16 %v76_v4, %v75_v2  ;;  %v94_v13 = vld [vmem:[#allocation5 + $0x98] sm:$0xff] }
  0x3a   :  { %v719_v8 = vpack.c.bf16 %v124_v6, %v123_v5  ;;  %v107_v9 = vld [vmem:[#allocation5 + $0x100] sm:$0xff]  ;;  %v108_v10 = vld [vmem:[#allocation5 + $0x108] sm:$0xff]  ;;  %688 = vmatprep.subr.bf16.mxu0 %v687_v3  ;;  %v77_v14 = vld [vmem:[#allocation5 + $0x10] sm:$0xff]  ;;  %v691_v16 = vpack.c.bf16 %v94_v13, %v93_v11 }
  0x3b   :  { %v721_v12 = vpack.c.bf16 %v108_v10, %v107_v9  ;;  %v78_v15 = vld [vmem:[#allocation5 + $0x18] sm:$0xff]  ;;  %690 = vmatpush3.bf16.msra.mxu0 %v689_v7  ;;  %v125_v18 = vld [vmem:[#allocation5 + $0x190] sm:$0xff]  ;;  %v95_v23 = vld [vmem:[#allocation5 + $0xa0] sm:$0xff] }
  0x3c   :  { %720 = vmatprep.subr.bf16.mxu1 %v719_v8  ;;  %v693_v17 = vpack.c.bf16 %v78_v15, %v77_v14  ;;  %v126_v19 = vld [vmem:[#allocation5 + $0x198] sm:$0xff]  ;;  %v109_v20 = vld [vmem:[#allocation5 + $0x110] sm:$0xff]  ;;  %v96_v24 = vld [vmem:[#allocation5 + $0xa8] sm:$0xff]  ;;  %692 = vmatprep.subr.bf16.mxu0 %v691_v16 }
  0x3d   :  { %722 = vmatpush3.bf16.msra.mxu1 %v721_v12  ;;  %v723_v21 = vpack.c.bf16 %v126_v19, %v125_v18  ;;  %v110_v22 = vld [vmem:[#allocation5 + $0x118] sm:$0xff]  ;;  %v695_v26 = vpack.c.bf16 %v96_v24, %v95_v23  ;;  %v79_v27 = vld [vmem:[#allocation5 + $0x20] sm:$0xff]  ;;  %v80_v28 = vld [vmem:[#allocation5 + $0x28] sm:$0xff] }
  0x3e   :  { %v725_v25 = vpack.c.bf16 %v110_v22, %v109_v20  ;;  %v127_v29 = vld [vmem:[#allocation5 + $0x1a0] sm:$0xff]  ;;  %v128_v30 = vld [vmem:[#allocation5 + $0x1a8] sm:$0xff]  ;;  %v697_v33 = vpack.c.bf16 %v80_v28, %v79_v27  ;;  %v97_v35 = vld [vmem:[#allocation5 + $0xb0] sm:$0xff] }
  0x3f   :  { %724 = vmatprep.subr.bf16.mxu1 %v723_v21  ;;  %v111_v31 = vld [vmem:[#allocation5 + $0x120] sm:$0xff]  ;;  %v112_v32 = vld [vmem:[#allocation5 + $0x128] sm:$0xff]  ;;  %694 = vmatpush3.bf16.msra.mxu0 %v693_v17  ;;  %v727_v34 = vpack.c.bf16 %v128_v30, %v127_v29  ;;  %v98_v36 = vld [vmem:[#allocation5 + $0xb8] sm:$0xff] }
  0x40   :  { %v81_v37 = vld [vmem:[#allocation5 + $0x30] sm:$0xff]  ;;  %696 = vmatprep.subr.bf16.mxu0 %v695_v26  ;;  %v729_v38 = vpack.c.bf16 %v112_v32, %v111_v31  ;;  %v699_v39 = vpack.c.bf16 %v98_v36, %v97_v35  ;;  %v82_v40 = vld [vmem:[#allocation5 + $0x38] sm:$0xff]  ;;  %v99_v46 = vld [vmem:[#allocation5 + $0xc0] sm:$0xff] }
  0x41   :  { %726 = vmatpush3.bf16.msra.mxu1 %v725_v25  ;;  %v129_v41 = vld [vmem:[#allocation5 + $0x1b0] sm:$0xff]  ;;  %v130_v42 = vld [vmem:[#allocation5 + $0x1b8] sm:$0xff]  ;;  %v100_v47 = vld [vmem:[#allocation5 + $0xc8] sm:$0xff]  ;;  %v701_v48 = vpack.c.bf16 %v82_v40, %v81_v37 }
  0x42   :  { %728 = vmatprep.subr.bf16.mxu1 %v727_v34  ;;  %v731_v43 = vpack.c.bf16 %v130_v42, %v129_v41  ;;  %v113_v44 = vld [vmem:[#allocation5 + $0x130] sm:$0xff]  ;;  %v114_v45 = vld [vmem:[#allocation5 + $0x138] sm:$0xff]  ;;  %v131_v49 = vld [vmem:[#allocation5 + $0x1c0] sm:$0xff]  ;;  %v703_v52 = vpack.c.bf16 %v100_v47, %v99_v46 }
  0x43   :  { %698 = vmatpush3.bf16.msra.mxu0 %v697_v33  ;;  %v132_v50 = vld [vmem:[#allocation5 + $0x1c8] sm:$0xff]  ;;  %v733_v51 = vpack.c.bf16 %v114_v45, %v113_v44  ;;  %v83_v53 = vld [vmem:[#allocation5 + $0x40] sm:$0xff]  ;;  %v101_v58 = vld [vmem:[#allocation5 + $0xd0] sm:$0xff] }
  0x44   :  { %700 = vmatprep.subr.bf16.mxu0 %v699_v39  ;;  %v84_v54 = vld [vmem:[#allocation5 + $0x48] sm:$0xff]  ;;  %v115_v55 = vld [vmem:[#allocation5 + $0x140] sm:$0xff]  ;;  %v735_v56 = vpack.c.bf16 %v132_v50, %v131_v49  ;;  %v102_v59 = vld [vmem:[#allocation5 + $0xd8] sm:$0xff] }
  0x45   :  { %730 = vmatpush3.bf16.msra.mxu1 %v729_v38  ;;  %v116_v57 = vld [vmem:[#allocation5 + $0x148] sm:$0xff]  ;;  %v133_v60 = vld [vmem:[#allocation5 + $0x1d0] sm:$0xff]  ;;  %v134_v61 = vld [vmem:[#allocation5 + $0x1d8] sm:$0xff]  ;;  %v705_v62 = vpack.c.bf16 %v84_v54, %v83_v53  ;;  %v707_v0 = vpack.c.bf16 %v102_v59, %v101_v58 }
  0x46   :  { %732 = vmatprep.subr.bf16.mxu1 %v731_v43  ;;  %v737_v63 = vpack.c.bf16 %v116_v57, %v115_v55  ;;  %v85_v1 = vld [vmem:[#allocation5 + $0x50] sm:$0xff]  ;;  %v86_v2 = vld [vmem:[#allocation5 + $0x58] sm:$0xff]  ;;  %v739_v4 = vpack.c.bf16 %v134_v61, %v133_v60  ;;  %v103_v6 = vld [vmem:[#allocation5 + $0xe0] sm:$0xff] }
  0x47   :  { %702 = vmatpush3.bf16.msra.mxu0 %v701_v48  ;;  %v117_v3 = vld [vmem:[#allocation5 + $0x150] sm:$0xff]  ;;  %v118_v5 = vld [vmem:[#allocation5 + $0x158] sm:$0xff]  ;;  %v104_v7 = vld [vmem:[#allocation5 + $0xe8] sm:$0xff]  ;;  %v709_v10 = vpack.c.bf16 %v86_v2, %v85_v1 }
  0x48   :  { %704 = vmatprep.subr.bf16.mxu0 %v703_v52  ;;  %v135_v8 = vld [vmem:[#allocation5 + $0x1e0] sm:$0xff]  ;;  %v136_v9 = vld [vmem:[#allocation5 + $0x1e8] sm:$0xff]  ;;  %v741_v13 = vpack.c.bf16 %v118_v5, %v117_v3  ;;  %v711_v14 = vpack.c.bf16 %v104_v7, %v103_v6  ;;  %v105_v19 = vld [vmem:[#allocation5 + $0xf0] sm:$0xff] }
  0x49   :  { %734 = vmatpush3.bf16.msra.mxu1 %v733_v51  ;;  %v87_v11 = vld [vmem:[#allocation5 + $0x60] sm:$0xff]  ;;  %v88_v12 = vld [vmem:[#allocation5 + $0x68] sm:$0xff]  ;;  %v743_v18 = vpack.c.bf16 %v136_v9, %v135_v8  ;;  %v106_v20 = vld [vmem:[#allocation5 + $0xf8] sm:$0xff] }
  0x4a   :  { %736 = vmatprep.subr.bf16.mxu1 %v735_v56  ;;  %v119_v15 = vld [vmem:[#allocation5 + $0x160] sm:$0xff]  ;;  %v120_v16 = vld [vmem:[#allocation5 + $0x168] sm:$0xff]  ;;  %v62_v21 = vld [vmem:[#allocation2 + $0x18] sm:$0xff]  ;;  %v713_v24 = vpack.c.bf16 %v88_v12, %v87_v11  ;;  %v715_v26 = vpack.c.bf16 %v106_v20, %v105_v19 }
  0x4b   :  { %706 = vmatpush3.bf16.msra.mxu0 %v705_v62  ;;  %v60_v17 = vld [vmem:[#allocation2 + $0x8] sm:$0xff]  ;;  %v137_v22 = vld [vmem:[#allocation5 + $0x1f0] sm:$0xff]  ;;  %v138_v23 = vld [vmem:[#allocation5 + $0x1f8] sm:$0xff]  ;;  %349 = vmatprep.mubr.f32.mxu1 %v62_v21  ;;  %v745_v25 = vpack.c.bf16 %v120_v16, %v119_v15 }
  0x4c   :  { %708 = vmatprep.subr.bf16.mxu0 %v707_v0  ;;  %274 = vmatprep.mubr.f32.mxu0 %v60_v17  ;;  %v89_v27 = vld [vmem:[#allocation5 + $0x70] sm:$0xff]  ;;  %v90_v28 = vld [vmem:[#allocation5 + $0x78] sm:$0xff]  ;;  %v747_v30 = vpack.c.bf16 %v138_v23, %v137_v22  ;;  %v155_v32 = vld [vmem:[#allocation5 + $0x280] sm:$0xff] }
  0x4d   :  { %738 = vmatpush3.bf16.msra.mxu1 %v737_v63  ;;  %v121_v29 = vld [vmem:[#allocation5 + $0x170] sm:$0xff]  ;;  %v122_v31 = vld [vmem:[#allocation5 + $0x178] sm:$0xff]  ;;  %v156_v33 = vld [vmem:[#allocation5 + $0x288] sm:$0xff]  ;;  %v717_v36 = vpack.c.bf16 %v90_v28, %v89_v27 }
  0x4e   :  { %740 = vmatprep.subr.bf16.mxu1 %v739_v4  ;;  %v187_v34 = vld [vmem:[#allocation5 + $0x380] sm:$0xff]  ;;  %v188_v35 = vld [vmem:[#allocation5 + $0x388] sm:$0xff]  ;;  %v749_v37 = vpack.c.bf16 %v122_v31, %v121_v29  ;;  %v751_v38 = vpack.c.bf16 %v156_v33, %v155_v32  ;;  %v157_v44 = vld [vmem:[#allocation5 + $0x290] sm:$0xff] }
  0x4f   :  { %710 = vmatpush3.bf16.msra.mxu0 %v709_v10  ;;  %v139_v39 = vld [vmem:[#allocation5 + $0x200] sm:$0xff]  ;;  %v140_v40 = vld [vmem:[#allocation5 + $0x208] sm:$0xff]  ;;  %v783_v42 = vpack.c.bf16 %v188_v35, %v187_v34  ;;  %v158_v45 = vld [vmem:[#allocation5 + $0x298] sm:$0xff] }
  0x50   :  { %712 = vmatprep.subr.bf16.mxu0 %v711_v14  ;;  %v171_v41 = vld [vmem:[#allocation5 + $0x300] sm:$0xff]  ;;  %v172_v43 = vld [vmem:[#allocation5 + $0x308] sm:$0xff]  ;;  %v189_v46 = vld [vmem:[#allocation5 + $0x390] sm:$0xff]  ;;  %v753_v49 = vpack.c.bf16 %v140_v40, %v139_v39  ;;  %v755_v52 = vpack.c.bf16 %v158_v45, %v157_v44 }
  0x51   :  { %742 = vmatpush3.bf16.msra.mxu1 %v741_v13  ;;  %v190_v47 = vld [vmem:[#allocation5 + $0x398] sm:$0xff]  ;;  %v59_v48 = vld [vmem:[#allocation2] sm:$0xff]  ;;  %v61_v50 = vld [vmem:[#allocation2 + $0x10] sm:$0xff]  ;;  %v785_v51 = vpack.c.bf16 %v172_v43, %v171_v41 }
  0x52   :  { %744 = vmatprep.subr.bf16.mxu1 %v743_v18  ;;  %v141_v53 = vld [vmem:[#allocation5 + $0x210] sm:$0xff]  ;;  %v142_v54 = vld [vmem:[#allocation5 + $0x218] sm:$0xff]  ;;  %v787_v56 = vpack.c.bf16 %v190_v47, %v189_v46  ;;  %v159_v58 = vld [vmem:[#allocation5 + $0x2a0] sm:$0xff] }
  0x53   :  { %714 = vmatpush3.bf16.msra.mxu0 %v713_v24  ;;  %v173_v55 = vld [vmem:[#allocation5 + $0x310] sm:$0xff]  ;;  %v174_v57 = vld [vmem:[#allocation5 + $0x318] sm:$0xff]  ;;  %v160_v59 = vld [vmem:[#allocation5 + $0x2a8] sm:$0xff]  ;;  %v757_v62 = vpack.c.bf16 %v142_v54, %v141_v53 }
  0x54   :  { %716 = vmatprep.subr.bf16.mxu0 %v715_v26  ;;  %v191_v60 = vld [vmem:[#allocation5 + $0x3a0] sm:$0xff]  ;;  %v192_v61 = vld [vmem:[#allocation5 + $0x3a8] sm:$0xff]  ;;  %v789_v63 = vpack.c.bf16 %v174_v57, %v173_v55  ;;  %v759_v0 = vpack.c.bf16 %v160_v59, %v159_v58  ;;  %v161_v6 = vld [vmem:[#allocation5 + $0x2b0] sm:$0xff] }
  0x55   :  { %746 = vmatpush3.bf16.msra.mxu1 %v745_v25  ;;  %v143_v1 = vld [vmem:[#allocation5 + $0x220] sm:$0xff]  ;;  %v144_v2 = vld [vmem:[#allocation5 + $0x228] sm:$0xff]  ;;  %v791_v4 = vpack.c.bf16 %v192_v61, %v191_v60  ;;  %v162_v7 = vld [vmem:[#allocation5 + $0x2b8] sm:$0xff] }
  0x56   :  { %748 = vmatprep.subr.bf16.mxu1 %v747_v30  ;;  %v175_v3 = vld [vmem:[#allocation5 + $0x320] sm:$0xff]  ;;  %v176_v5 = vld [vmem:[#allocation5 + $0x328] sm:$0xff]  ;;  %v193_v8 = vld [vmem:[#allocation5 + $0x3b0] sm:$0xff]  ;;  %v761_v10 = vpack.c.bf16 %v144_v2, %v143_v1  ;;  %v763_v15 = vpack.c.bf16 %v162_v7, %v161_v6 }
  0x57   :  { %718 = vmatpush3.bf16.msra.mxu0 %v717_v36  ;;  %v194_v9 = vld [vmem:[#allocation5 + $0x3b8] sm:$0xff]  ;;  %v145_v11 = vld [vmem:[#allocation5 + $0x230] sm:$0xff]  ;;  %v68_v13 = vld [vmem:[#allocation2 + $0x48] sm:$0xff]  ;;  %v793_v14 = vpack.c.bf16 %v176_v5, %v175_v3 }
  0x58   :  { %752 = vmatprep.subr.bf16.mxu0 %v751_v38  ;;  %v146_v12 = vld [vmem:[#allocation5 + $0x238] sm:$0xff]  ;;  %v177_v16 = vld [vmem:[#allocation5 + $0x330] sm:$0xff]  ;;  %v67_v18 = vld [vmem:[#allocation2 + $0x40] sm:$0xff]  ;;  %v795_v19 = vpack.c.bf16 %v194_v9, %v193_v8 }
  0x59   :  { %750 = vmatpush3.bf16.msra.mxu1 %v749_v37  ;;  %v178_v17 = vld [vmem:[#allocation5 + $0x338] sm:$0xff]  ;;  %v163_v20 = vld [vmem:[#allocation5 + $0x2c0] sm:$0xff]  ;;  %v164_v21 = vld [vmem:[#allocation5 + $0x2c8] sm:$0xff]  ;;  %v765_v26 = vpack.c.bf16 %v146_v12, %v145_v11 }
  0x5a   :  { %784 = vmatprep.subr.bf16.mxu1 %v783_v42  ;;  %275 = vmatmul.mubr.f32.vlgmr.msra.gmra.mrb[0].mxu0 %v59_v48  ;;  %v70_v22 = vld [vmem:[#allocation2 + $0x58] sm:$0xff]  ;;  %v195_v23 = vld [vmem:[#allocation5 + $0x3c0] sm:$0xff]  ;;  %v196_v24 = vld [vmem:[#allocation5 + $0x3c8] sm:$0xff]  ;;  %v797_v29 = vpack.c.bf16 %v178_v17, %v177_v16  ;;  %v767_v30 = vpack.c.bf16 %v164_v21, %v163_v20 }
  0x5b   :  { %754 = vmatpush3.bf16.msra.mxu0 %v753_v49  ;;  %279 = vmatprep.mubr.f32.mxu0 %v68_v13  ;;  %v69_v25 = vld [vmem:[#allocation2 + $0x50] sm:$0xff]  ;;  %v147_v27 = vld [vmem:[#allocation5 + $0x240] sm:$0xff]  ;;  %v148_v28 = vld [vmem:[#allocation5 + $0x248] sm:$0xff]  ;;  %v799_v34 = vpack.c.bf16 %v196_v24, %v195_v23 }
  0x5c   :  { %350 = vmatmul.mubr.f32.vlgmr.msra.gmra.mrb[0].mxu1 %v61_v50  ;;  %756 = vmatprep.subr.bf16.mxu0 %v755_v52  ;;  %v179_v31 = vld [vmem:[#allocation5 + $0x340] sm:$0xff]  ;;  %v180_v32 = vld [vmem:[#allocation5 + $0x348] sm:$0xff]  ;;  %v165_v35 = vld [vmem:[#allocation5 + $0x2d0] sm:$0xff]  ;;  %v769_v40 = vpack.c.bf16 %v148_v28, %v147_v27 }
  0x5d   :  { %786 = vmatpush3.bf16.msra.mxu1 %v785_v51  ;;  %354 = vmatprep.mubr.f32.mxu1 %v70_v22  ;;  %v64_v33 = vld [vmem:[#allocation2 + $0x28] sm:$0xff]  ;;  %v166_v36 = vld [vmem:[#allocation5 + $0x2d8] sm:$0xff]  ;;  %v197_v38 = vld [vmem:[#allocation5 + $0x3d0] sm:$0xff]  ;;  %v801_v41 = vpack.c.bf16 %v180_v32, %v179_v31 }
  0x5e   :  { %788 = vmatprep.subr.bf16.mxu1 %v787_v56  ;;  %280 = vmatmul.mubr.f32.gmra.mrb[2].mxu0 %v67_v18  ;;  %v66_v37 = vld [vmem:[#allocation2 + $0x38] sm:$0xff]  ;;  %v771_v42 = vpack.c.bf16 %v166_v36, %v165_v35  ;;  %v149_v43 = vld [vmem:[#allocation5 + $0x250] sm:$0xff]  ;;  %v167_v48 = vld [vmem:[#allocation5 + $0x2e0] sm:$0xff] }
  0x5f   :  { %758 = vmatpush3.bf16.msra.mxu0 %v757_v62  ;;  %424 = vmatprep.mubr.f32.mxu0 %v64_v33  ;;  %v198_v39 = vld [vmem:[#allocation5 + $0x3d8] sm:$0xff]  ;;  %v181_v45 = vld [vmem:[#allocation5 + $0x350] sm:$0xff]  ;;  %v168_v49 = vld [vmem:[#allocation5 + $0x2e8] sm:$0xff] }
  0x60   :  { %760 = vmatprep.subr.bf16.mxu0 %v759_v0  ;;  %355 = vmatmul.mubr.f32.gmra.mrb[2].mxu1 %v69_v25  ;;  %v150_v44 = vld [vmem:[#allocation5 + $0x258] sm:$0xff]  ;;  %v803_v46 = vpack.c.bf16 %v198_v39, %v197_v38  ;;  %v199_v50 = vld [vmem:[#allocation5 + $0x3e0] sm:$0xff]  ;;  %v200_v51 = vld [vmem:[#allocation5 + $0x3e8] sm:$0xff]  ;;  %v775_v54 = vpack.c.bf16 %v168_v49, %v167_v48 }
  0x61   :  { %790 = vmatpush3.bf16.msra.mxu1 %v789_v63  ;;  %499 = vmatprep.mubr.f32.mxu1 %v66_v37  ;;  %v182_v47 = vld [vmem:[#allocation5 + $0x358] sm:$0xff]  ;;  %v773_v52 = vpack.c.bf16 %v150_v44, %v149_v43  ;;  %v151_v55 = vld [vmem:[#allocation5 + $0x260] sm:$0xff]  ;;  %v152_v56 = vld [vmem:[#allocation5 + $0x268] sm:$0xff]  ;;  %v807_v58 = vpack.c.bf16 %v200_v51, %v199_v50 }
  0x62   :  { %792 = vmatprep.subr.bf16.mxu1 %v791_v4  ;;  %v805_v53 = vpack.c.bf16 %v182_v47, %v181_v45  ;;  %v183_v57 = vld [vmem:[#allocation5 + $0x360] sm:$0xff]  ;;  %v184_v59 = vld [vmem:[#allocation5 + $0x368] sm:$0xff]  ;;  %v169_v60 = vld [vmem:[#allocation5 + $0x2f0] sm:$0xff]  ;;  %v777_v0 = vpack.c.bf16 %v152_v56, %v151_v55 }
  0x63   :  { %762 = vmatpush3.bf16.msra.mxu0 %v761_v10  ;;  %v170_v61 = vld [vmem:[#allocation5 + $0x2f8] sm:$0xff]  ;;  %v201_v62 = vld [vmem:[#allocation5 + $0x3f0] sm:$0xff]  ;;  %v809_v1 = vpack.c.bf16 %v184_v59, %v183_v57  ;;  %v63_v10 = vld [vmem:[#allocation2 + $0x20] sm:$0xff] }
  0x64   :  { %764 = vmatprep.subr.bf16.mxu0 %v763_v15  ;;  %v202_v63 = vld [vmem:[#allocation5 + $0x3f8] sm:$0xff]  ;;  %v779_v2 = vpack.c.bf16 %v170_v61, %v169_v60  ;;  %v153_v3 = vld [vmem:[#allocation5 + $0x270] sm:$0xff]  ;;  %v72_v12 = vld [vmem:[#allocation2 + $0x68] sm:$0xff] }
  0x65   :  { %794 = vmatpush3.bf16.msra.mxu1 %v793_v14  ;;  %v154_v4 = vld [vmem:[#allocation5 + $0x278] sm:$0xff]  ;;  %v811_v5 = vpack.c.bf16 %v202_v63, %v201_v62  ;;  %v185_v6 = vld [vmem:[#allocation5 + $0x370] sm:$0xff]  ;;  %v71_v14 = vld [vmem:[#allocation2 + $0x60] sm:$0xff] }
  0x66   :  { %796 = vmatprep.subr.bf16.mxu1 %v795_v19  ;;  %v186_v7 = vld [vmem:[#allocation5 + $0x378] sm:$0xff]  ;;  %v781_v8 = vpack.c.bf16 %v154_v4, %v153_v3  ;;  %v65_v11 = vld [vmem:[#allocation2 + $0x30] sm:$0xff]  ;;  %v534_v17 = vld [vmem:[%s1012_s2] ss:$0 sm:$0xff]  ;;  %s924_s2 = smov [#allocation8]  }
  0x67   :  { %766 = vmatpush3.bf16.msra.mxu0 %v765_v26  ;;  %v813_v9 = vpack.c.bf16 %v186_v7, %v185_v6  ;;  %v74_v13 = vld [vmem:[#allocation2 + $0x78] sm:$0xff]  ;;  %v73_v15 = vld [vmem:[#allocation2 + $0x70] sm:$0xff]  ;;  %v511_v50 = vld [vmem:[#allocation7 + $0x8] sm:$0xff]  ;;  %s521_s30 = sshll.u32 %s924_s2, 4  ;;  %s522_s30 = int_to_ptr.vmem [resolvable:$true] %s521_s30 }
  0x68   :  { %768 = vmatprep.subr.bf16.mxu0 %v767_v30  ;;  %s889_s5 = scalar_lea.vmem %s522_s30, 256  ;;  %p894_p11 = scmp.lt.s32.totalorder %s522_s30, %s522_s30 }
  0x69   :  { %798 = vmatpush3.bf16.msra.mxu1 %v797_v29  ;;  %p890_p10 = scmp.ne.s32.totalorder %s522_s30, %s889_s5  ;;  %p895_p12 = scmp.lt.s32.totalorder %s889_s5, %s889_s5 }
  0x6a   :  { %800 = vmatprep.subr.bf16.mxu1 %v799_v34 }
  0x6b   :  { %770 = vmatpush3.bf16.msra.mxu0 %v769_v40  ;;  %p896_p13 = por %p895_p12, %p894_p11 }
  0x6c   :  { %772 = vmatprep.subr.bf16.mxu0 %v771_v42 }
  0x6d   :  { %802 = vmatpush3.bf16.msra.mxu1 %v801_v41  ;;  %v510_v41 = vld [vmem:[#allocation7] sm:$0xff]  ;;  %p897_p0 = pnand %p896_p13, %p890_p10 }
  0x6e   :  { %804 = vmatprep.subr.bf16.mxu1 %v803_v46 }
  0x6f   :  { %774 = vmatpush3.bf16.msra.mxu0 %v773_v52 }
  0x70   :  { %776 = vmatprep.subr.bf16.mxu0 %v775_v54 }
  0x71   :  { %806 = vmatpush3.bf16.msra.mxu1 %v805_v53 }
  0x72   :  { %808 = vmatprep.subr.bf16.mxu1 %v807_v58 }
  0x73   :  { %778 = vmatpush3.bf16.msra.mxu0 %v777_v0 }
  0x74   :  { %780 = vmatprep.subr.bf16.mxu0 %v779_v2 }
  0x75   :  { %810 = vmatpush3.bf16.msra.mxu1 %v809_v1 }
  0x76   :  { %812 = vmatprep.subr.bf16.mxu1 %v811_v5 }
  0x77   :  { %782 = vmatpush3.bf16.msra.mxu0 %v781_v8 }
  0x79   :  { %814 = vmatpush3.bf16.msra.mxu1 %v813_v9 }
  0x7a   :  { %425 = vmatmul.mubr.f32.vlgmr.msra.gmra.mrb[4].mxu0 %v63_v10 }
  0x7b   :  { %429 = vmatprep.mubr.f32.mxu0 %v72_v12 }
  0x7c   :  { %500 = vmatmul.mubr.f32.vlgmr.msra.gmra.mrb[4].mxu1 %v65_v11 }
  0x7d   :  { %504 = vmatprep.mubr.f32.mxu1 %v74_v13 }
  0x7e   :  { %430 = vmatmul.mubr.f32.gmra.mrb[6].mxu0 %v71_v14 }
  0x80   :  { %505 = vmatmul.mubr.f32.gmra.mrb[6].mxu1 %v73_v15 }
 0x12d   :  { %v567_v16 = vpop.f32.mrb[0].mxu0 }
 0x12e   :  { %v568_v18 = vpop.f32.mrb[1].mxu0 }
 0x12f   :  { %v605_v19 = vpop.f32.mrb[0].mxu1  ;;  %v569_v20 = vadd.f32 %v568_v18, %v567_v16 }
 0x130   :  { %v606_v21 = vpop.f32.mrb[1].mxu1 }
 0x131   :  { %v607_v22 = vadd.f32 %v606_v21, %v605_v19  ;;  %v277_v23 = vadd.f32 %v569_v20, %v534_v17  ;;  %v570_v25 = vpop.f32.mrb[2].mxu0 }
 0x132   :  { %v571_v26 = vpop.f32.mrb[3].mxu0 }
 0x133   :  { %v352_v24 = vadd.f32 %v607_v22, %v277_v23  ;;  %v608_v27 = vpop.f32.mrb[2].mxu1  ;;  %v572_v28 = vadd.f32 %v571_v26, %v570_v25 }
 0x134   :  { %v609_v29 = vpop.f32.mrb[3].mxu1 }
 0x135   :  { %v610_v30 = vadd.f32 %v609_v29, %v608_v27  ;;  %v282_v31 = vadd.f32 %v572_v28, %v534_v17 }
 0x137   :  { %v357_v32 = vadd.f32 %v610_v30, %v282_v31 }
 0x14d   :  { %v643_v33 = vpop.f32.mrb[4].mxu0 }
 0x14e   :  { %v644_v34 = vpop.f32.mrb[5].mxu0 }
 0x14f   :  { %v681_v35 = vpop.f32.mrb[4].mxu1  ;;  %v645_v36 = vadd.f32 %v644_v34, %v643_v33 }
 0x150   :  { %v682_v37 = vpop.f32.mrb[5].mxu1 }
 0x151   :  { %v683_v38 = vadd.f32 %v682_v37, %v681_v35  ;;  %v427_v39 = vadd.f32 %v645_v36, %v352_v24  ;;  %v646_v40 = vpop.f32.mrb[6].mxu0 }
 0x152   :  { %v647_v42 = vpop.f32.mrb[7].mxu0 }
 0x153   :  { %v684_v43 = vpop.f32.mrb[6].mxu1  ;;  %v502_v44 = vadd.f32 %v683_v38, %v427_v39  ;;  %v648_v45 = vadd.f32 %v647_v42, %v646_v40 }
 0x154   :  { %v685_v46 = vpop.f32.mrb[7].mxu1 }
 0x155   :  { %v686_v47 = vadd.f32 %v685_v46, %v684_v43  ;;  %v512_v48 = vmul.f32 %v510_v41, %v502_v44  ;;  %v432_v49 = vadd.f32 %v648_v45, %v357_v32 }
 0x157   :  { %514 = vst [vmem:[#allocation8] sm:$0xff] %v512_v48  ;;  %v507_v51 = vadd.f32 %v686_v47, %v432_v49 }
 0x159   :  { %v513_v52 = vmul.f32 %v511_v50, %v507_v51 }
 0x15b   :  { %515 = vst [vmem:[#allocation8 + $0x8] sm:$0xff] %v513_v52 }
 0x15c   :  { %900 = shalt.err (!%p897_p0)
}
 0x15d   :  { %s901_s8 = scalar_lea.hbm %s1014_s4, 256 }
 0x15e   :  { %p902_p1 = scmp.ne.s32.totalorder %s1014_s4, %s901_s8  ;;  %p905_p2 = scmp.lt.u32.totalorder %s901_s8, %s1014_s4 }
 0x160   :  { %p907_p3 = pnand %p905_p2, %p902_p1 }
 0x162   :  { %910 = shalt.err (!%p907_p3)
}
 0x163   :  { %527 = dma.vmem_to_hbm [thread:$0]  %s522_s30, 256, %s1014_s4, [#allocation4], %s918_s25, %s918_s25, %s919_s26  }
 0x164   :  { %915 = dma.done.wait [#allocation4], 256  }
 0x165   :  { %916 = vsyncadd [#allocation4], 4294967040 }
 0x166   :  { %531 = vsyncpa [#allocation3], 1 }
 0x167   :  { %532 = vsyncpa [#allocation6], 1 }
 0x168   :  { %533 = vsyncpa [#allocation4], 1 }

</bundles_post_ra>
